<compile_context>
chip_gen: v7x
topology: tpu7x:2x2x1
jax: 0.10.0
libtpu: 0.0.40
codegen_flags: <defaults>
</compile_context>

<pallas_src>
from functools import partial

import jax
import jax.numpy as jnp
from jax.experimental import pallas as pl
from jax.experimental.pallas import tpu as pltpu

LEAKY_SLOPE = 0.1
BN_EPS = 1e-5
LANE = 128


def _round_up(x, m):
    return (x + m - 1) // m * m


def _tpu_vmem_capacity_bytes():
    """Generation-aware VMEM capacity (v5e/v6e: 128 MiB, v7x: 64 MiB per TensorCore)."""
    try:
        cap = getattr(pltpu.get_tpu_info(), "vmem_capacity_bytes", None)
        if cap:
            return int(cap)
    except Exception:
        pass
    return 64 * 1024 * 1024     # conservative fallback (v7x per-TensorCore figure)


_VMEM_CAP = _tpu_vmem_capacity_bytes()
_VMEM_LIMIT = min(_VMEM_CAP // 2, 96 * 1024 * 1024)    # scoped limit handed to Mosaic
_ROW_TILE_BUDGET = (3 * _VMEM_LIMIT) // 4              # working-set budget, 3x3 kernel
_MATMUL_BUDGET = (3 * _VMEM_LIMIT) // 4                # working-set budget, matmul kernel


# ---------------------------------------------------------------------------------------
# Kernel 1: fused matmul + bias + LeakyReLU (1x1 convs and stride-2 conv via im2col).
# bf16 inputs -> MXU -> f32 accumulate -> f32 epilogue -> bf16 out.
# ---------------------------------------------------------------------------------------
def _matmul_bias_lrelu_kernel(x_ref, w_ref, b_ref, o_ref):
    acc = jnp.dot(x_ref[...], w_ref[...], preferred_element_type=jnp.float32)
    y = acc + b_ref[...]
    o_ref[...] = jnp.where(y > 0, y, LEAKY_SLOPE * y).astype(o_ref.dtype)


def _fused_matmul(x2d, w2d, bias_row, out_dtype=jnp.bfloat16):
    """(M, K) @ (K, Cout_p) + bias, LeakyReLU. K and Cout_p are multiples of 128."""
    m, k = x2d.shape
    cout_p = w2d.shape[1]

    # Keep the whole (K, Cout_p) weight VMEM-resident when it is small (true for every
    # 1x1 conv here): with tile_n == Cout_p the weight block index is constant, so the
    # pipeline DMAs it exactly once instead of re-streaming it per row tile.
    if k * cout_p * 2 <= 4 * 1024 * 1024:
        tile_n = cout_p
    elif cout_p % 256 == 0:                 # v6e/v7x MXUs are 256 wide
        tile_n = 256
    else:
        tile_n = 128

    tile_m = 512
    while tile_m > 8 and 2 * (tile_m * k * 2 + k * tile_n * 2 + tile_m * tile_n * 2) \
            > _MATMUL_BUDGET:
        tile_m //= 2
    if m < tile_m:
        tile_m = _round_up(m, 8)
    m_pad = _round_up(m, tile_m)
    if m_pad != m:
        x2d = jnp.pad(x2d, ((0, m_pad - m), (0, 0)))

    grid = (m_pad // tile_m, cout_p // tile_n)

    out = pl.pallas_call(
        _matmul_bias_lrelu_kernel,
        grid=grid,
        in_specs=[
            pl.BlockSpec((tile_m, k), lambda i, j: (i, 0)),
            pl.BlockSpec((k, tile_n), lambda i, j: (0, j)),
            pl.BlockSpec((1, tile_n), lambda i, j: (0, j)),
        ],
        out_specs=pl.BlockSpec((tile_m, tile_n), lambda i, j: (i, j)),
        out_shape=jax.ShapeDtypeStruct((m_pad, cout_p), out_dtype),
        compiler_params=pltpu.CompilerParams(
            dimension_semantics=("parallel", "parallel"),
            vmem_limit_bytes=_VMEM_LIMIT),
    )(x2d, w2d, bias_row)
    return out[:m]


# ---------------------------------------------------------------------------------------
# Kernel 2: direct 3x3 stride-1 conv with manual halo DMA (no im2col), optional fused
# residual add.  Value-semantics accumulation over the 9 taps (single output store),
# column shifts hoisted (3 window views instead of 9), per-image double buffering so the
# batch grid axis can be 'parallel'.
# ---------------------------------------------------------------------------------------
def _conv3x3_s1_body(x_hbm, w_ref, b_ref, r_ref, o_ref, xbuf, sem, *,
                     th_out, wout, cin_p):
    th_in = th_out + 2
    n = pl.program_id(0)
    r = pl.program_id(1)
    num_r = pl.num_programs(1)
    slot = r % 2

    def copy_rows(dst_slot, src_n, src_r):
        # Descriptor is reconstructed identically for start and wait (consistent src/dst).
        return pltpu.make_async_copy(
            x_hbm.at[src_n, pl.ds(src_r * th_out, th_in)],
            xbuf.at[dst_slot],
            sem.at[dst_slot],
        )

    # Prime the per-image pipeline on the first row tile of each image (keeps pipeline
    # state self-contained per image so the batch axis stays 'parallel' for megacore).
    @pl.when(r == 0)
    def _():
        copy_rows(slot, n, r).start()

    # Wait for the current halo window (started above, or prefetched by the previous step).
    copy_rows(slot, n, r).wait()

    # Prefetch the next row tile of the SAME image into the other slot.
    @pl.when(r + 1 < num_r)
    def _():
        copy_rows(1 - slot, n, r + 1).start()

    # Hoist the column (dj) shift: 3 flattened, column-shifted views of the halo window.
    xs = [xbuf[slot, :, pl.ds(dj, wout), :].reshape(th_in * wout, cin_p)
          for dj in range(3)]

    # 9 MXU matmuls accumulated in a value (no VMEM accumulator read-modify-writes).
    acc = None
    for di in range(3):
        lo = di * wout
        hi = lo + th_out * wout
        for dj in range(3):
            d = jnp.dot(xs[dj][lo:hi, :], w_ref[di * 3 + dj],
                        preferred_element_type=jnp.float32)
            acc = d if acc is None else acc + d

    y = acc + b_ref[...]
    y = jnp.where(y > 0, y, LEAKY_SLOPE * y)
    if r_ref is not None:
        y = y + r_ref[...].astype(jnp.float32)          # fused residual add
    o_ref[...] = y.astype(o_ref.dtype)                  # single store of the output tile


def _conv3x3_s1_kernel(x_hbm, w_ref, b_ref, o_ref, xbuf, sem, **kw):
    _conv3x3_s1_body(x_hbm, w_ref, b_ref, None, o_ref, xbuf, sem, **kw)


def _conv3x3_s1_res_kernel(x_hbm, w_ref, b_ref, r_ref, o_ref, xbuf, sem, **kw):
    _conv3x3_s1_body(x_hbm, w_ref, b_ref, r_ref, o_ref, xbuf, sem, **kw)


# ---------------------------------------------------------------------------------------
# Wrappers
# ---------------------------------------------------------------------------------------
def _fold_weights(p, cin_p, cout_p):
    """Fold BN scale into conv weights, pad channels to 128-multiples, cast to bf16."""
    w = p["w"]
    _, _, cin, cout = w.shape
    wf = (w * p["scale"]).astype(jnp.float32)
    wf = jnp.pad(wf, ((0, 0), (0, 0), (0, cin_p - cin), (0, cout_p - cout)))
    bf = jnp.pad(p["bias"], (0, cout_p - cout)).reshape(1, cout_p).astype(jnp.float32)
    return wf.astype(jnp.bfloat16), bf


def _darknet_conv1x1(x, p, cout_p):
    n, h, w_, cin_p = x.shape
    wf, bf = _fold_weights(p, cin_p, cout_p)
    out = _fused_matmul(x.reshape(n * h * w_, cin_p), wf.reshape(cin_p, cout_p), bf)
    return out.reshape(n, h, w_, cout_p)


def _darknet_conv3x3_s2(x, p, cout_p):
    """3x3 stride-2 downsample conv via COMPACT bf16 im2col (K = 9*cin padded to 128)."""
    n, h, w_, cin = x.shape                              # x has UNPADDED channels
    cout = p["w"].shape[-1]
    k = 9 * cin
    k_p = _round_up(k, LANE)

    wf = (p["w"] * p["scale"]).astype(jnp.float32).reshape(k, cout)
    wf = jnp.pad(wf, ((0, k_p - k), (0, cout_p - cout))).astype(jnp.bfloat16)
    bf = jnp.pad(p["bias"], (0, cout_p - cout)).reshape(1, cout_p).astype(jnp.float32)

    xp = jnp.pad(x, ((0, 0), (1, 1), (1, 1), (0, 0)))
    hout = (h + 2 - 3) // 2 + 1
    wout = (w_ + 2 - 3) // 2 + 1
    taps = [xp[:, i:i + 2 * hout:2, j:j + 2 * wout:2, :]
            for i in range(3) for j in range(3)]
    patches = jnp.concatenate(taps, axis=-1).reshape(n * hout * wout, k)
    if k_p != k:
        patches = jnp.pad(patches, ((0, 0), (0, k_p - k)))
    out = _fused_matmul(patches, wf, bf)
    return out.reshape(n, hout, wout, cout_p)


def _pick_row_tile(hout, wout, w_pad, cin_p, cout_p, budget):
    cands = [t for t in range(hout, 0, -1)
             if hout % t == 0 and (t == hout or (t * wout) % 8 == 0)]
    w_bytes = 2 * 9 * cin_p * cout_p * 2                # double-buffered bf16 weights
    for t in cands:
        need = (w_bytes
                + 2 * (t + 2) * w_pad * cin_p * 2       # double-buffered bf16 halo window
                + 2 * 2 * t * wout * cout_p * 2         # double-buffered out + residual
                + 2 * cout_p * 4)                       # bias
        if need <= budget:
            return t
    return cands[-1]


def _darknet_conv3x3_s1(x, p, cout_p, residual=None):
    """3x3 stride-1 conv + BN + LeakyReLU (+ fused residual add), direct halo kernel."""
    n, h, w_, cin_p = x.shape
    wf, bf = _fold_weights(p, cin_p, cout_p)
    w9 = wf.reshape(9, cin_p, cout_p)

    xp = jnp.pad(x, ((0, 0), (1, 1), (1, 1), (0, 0)))   # spatial zero pad (stays in HBM)
    hout, wout, w_pad = h, w_, w_ + 2

    th = _pick_row_tile(hout, wout, w_pad, cin_p, cout_p, _ROW_TILE_BUDGET)
    grid = (n, hout // th)

    in_specs = [
        pl.BlockSpec(memory_space=pl.ANY),                          # raw HBM activation
        pl.BlockSpec((9, cin_p, cout_p), lambda b, r: (0, 0, 0)),   # folded weights
        pl.BlockSpec((1, cout_p), lambda b, r: (0, 0)),             # bias
    ]
    args = [xp, w9, bf]
    if residual is None:
        kern = _conv3x3_s1_kernel
    else:
        kern = _conv3x3_s1_res_kernel
        in_specs.append(pl.BlockSpec((None, th * wout, cout_p), lambda b, r: (b, r, 0)))
        args.append(residual.reshape(n, hout * wout, cout_p))

    out = pl.pallas_call(
        partial(kern, th_out=th, wout=wout, cin_p=cin_p),
        grid=grid,
        in_specs=in_specs,
        out_specs=pl.BlockSpec((None, th * wout, cout_p), lambda b, r: (b, r, 0)),
        out_shape=jax.ShapeDtypeStruct((n, hout * wout, cout_p), jnp.bfloat16),
        scratch_shapes=[
            pltpu.VMEM((2, th + 2, w_pad, cin_p), jnp.bfloat16),    # halo double buffer
            pltpu.SemaphoreType.DMA((2,)),
        ],
        compiler_params=pltpu.CompilerParams(
            # batch axis is parallel (per-image DMA pipeline state); row axis sequential
            dimension_semantics=("parallel", "arbitrary"),
            vmem_limit_bytes=_VMEM_LIMIT),
    )(*args)
    return out.reshape(n, hout, wout, cout_p)


# ---------------------------------------------------------------------------------------
# Deterministic parameter init (synthetic, no checkpoint)
# ---------------------------------------------------------------------------------------
def init_darknet_conv(key, cin, cout, size):
    wk, gk, bk, mk, vk = jax.random.split(key, 5)
    fan_in = cin * size * size
    w = jax.random.normal(wk, (size, size, cin, cout), jnp.float32) / jnp.sqrt(
        jnp.float32(fan_in))
    gamma = 1.0 + 0.1 * jax.random.normal(gk, (cout,), jnp.float32)
    beta = 0.1 * jax.random.normal(bk, (cout,), jnp.float32)
    running_mean = 0.1 * jax.random.normal(mk, (cout,), jnp.float32)
    running_var = jnp.abs(jax.random.normal(vk, (cout,), jnp.float32)) + 0.5
    scale = gamma / jnp.sqrt(running_var + BN_EPS)      # fold BN into affine
    bias = beta - running_mean * scale
    return dict(w=w, scale=scale, bias=bias)


def darknet_block_init(key, in_filters, out_filters, blocks):
    keys = jax.random.split(key, 1 + 2 * blocks)
    params = dict(dark_conv=init_darknet_conv(keys[0], in_filters, out_filters, 3),
                  res=[])
    for b in range(blocks):
        p1 = init_darknet_conv(keys[1 + 2 * b], out_filters, out_filters // 2, 1)
        p2 = init_darknet_conv(keys[2 + 2 * b], out_filters // 2, out_filters, 3)
        params["res"].append((p1, p2))
    return params


# ---------------------------------------------------------------------------------------
# DarknetBlock forward (Pallas)
# ---------------------------------------------------------------------------------------
def darknet_block_forward(params, x_nchw):
    x = jnp.transpose(x_nchw, (0, 2, 3, 1))                         # NCHW -> NHWC

    p = params["dark_conv"]
    cout = p["w"].shape[-1]
    cout_p = _round_up(cout, LANE)
    # 3x3 stride-2 downsample: compact im2col operates on the UNPADDED channel count.
    x = _darknet_conv3x3_s2(x.astype(jnp.bfloat16), p, cout_p)

    for p1, p2 in params["res"]:
        mid_p = _round_up(p1["w"].shape[-1], LANE)
        y = _darknet_conv1x1(x, p1, mid_p)                          # 1x1
        x = _darknet_conv3x3_s1(y, p2, cout_p, residual=x)          # 3x3 + fused residual

    x = x[..., :cout].astype(jnp.float32)
    return jnp.transpose(x, (0, 3, 1, 2))                           # NHWC -> NCHW


# ---------------------------------------------------------------------------------------
# Pure-JAX references (correctness checks)
# ---------------------------------------------------------------------------------------
def darknet_block_reference(params, x_nchw, emulate_kernel_dtypes=False):
    """Reference forward. With emulate_kernel_dtypes=True it applies the same bf16
    quantisation of matmul inputs / inter-layer activations as the Pallas path
    (f32 accumulation + f32 epilogue), for a tight numerical comparison."""
    def q(v):
        return v.astype(jnp.bfloat16) if emulate_kernel_dtypes else v

    def ref_conv(x, p, stride):
        kh = p["w"].shape[0]
        pad = (kh - 1) // 2
        w = q((p["w"] * p["scale"]).astype(jnp.float32))
        y = jax.lax.conv_general_dilated(
            x.astype(jnp.float32), w.astype(jnp.float32),
            window_strides=(stride, stride), padding=((pad, pad), (pad, pad)),
            dimension_numbers=("NHWC", "HWIO", "NHWC"),
            preferred_element_type=jnp.float32)
        y = y + p["bias"]
        return jnp.where(y > 0, y, LEAKY_SLOPE * y)

    x = q(jnp.transpose(x_nchw, (0, 2, 3, 1)))
    x = q(ref_conv(x, params["dark_conv"], 2))
    for p1, p2 in params["res"]:
        y = q(ref_conv(x, p1, 1))
        x = q(ref_conv(y, p2, 1) + x.astype(jnp.float32))
    return jnp.transpose(x.astype(jnp.float32), (0, 3, 1, 2))


if __name__ == "__main__":
    key = jax.random.PRNGKey(0)
    pkey, xkey = jax.random.split(key)

    in_filters, out_filters, blocks = 4, 8, 2
    params = darknet_block_init(pkey, in_filters, out_filters, blocks)
    x = jax.random.normal(xkey, (2, in_filters, 16, 16), jnp.float32)

    out = jax.block_until_ready(darknet_block_forward(params, x))
    assert out.shape == (2, out_filters, 8, 8), out.shape

    ref_q = darknet_block_reference(params, x, emulate_kernel_dtypes=True)
    ref_f = darknet_block_reference(params, x)
    err_q = float(jnp.max(jnp.abs(out - ref_q)))
    err_f = float(jnp.max(jnp.abs(out - ref_f)))
    # Tight check vs a reference applying the same bf16 quantisation as the kernels.
    assert err_q < 2e-2, f"mismatch vs bf16-emulating reference (max abs err {err_q})"
    # Loose sanity check vs the pure-f32 PyTorch-equivalent reference (bf16 MXU inputs
    # bound the achievable accuracy here).
    assert err_f < 0.5, f"gross mismatch vs f32 reference (max abs err {err_f})"
    print("KERNEL_OK")
</pallas_src>

<mosaic_0001>
module attributes {stable_mosaic.version = 11 : i64} {
  func.func @_matmul_bias_lrelu_kernel(%arg0: i32, %arg1: i32, %arg2: memref<128x128xbf16, #tpu.memory_space<vmem>>, %arg3: memref<128x128xbf16, #tpu.memory_space<vmem>>, %arg4: memref<1x128xf32, #tpu.memory_space<vmem>>, %arg5: memref<128x128xbf16, #tpu.memory_space<vmem>>) attributes {dimension_semantics = [#tpu.dimension_semantics<parallel>, #tpu.dimension_semantics<parallel>], iteration_bounds = array<i64: 1, 1>, scalar_prefetch = 0 : i64, scratch_operands = 0 : i64, tpu.core_type = #tpu.core_type<tc>, window_params = [{transform_indices = @transform_0, window_bounds = array<i64: 128, 128>}, {transform_indices = @transform_1, window_bounds = array<i64: 128, 128>}, {transform_indices = @transform_2, window_bounds = array<i64: 1, 128>}, {transform_indices = @transform_3, window_bounds = array<i64: 128, 128>}]} {
    %c0 = arith.constant 0 : index
    %c0_0 = arith.constant 0 : index
    %0 = vector.load %arg2[%c0, %c0_0] : memref<128x128xbf16, #tpu.memory_space<vmem>>, vector<128x128xbf16>
    %c0_1 = arith.constant 0 : index
    %c0_2 = arith.constant 0 : index
    %1 = vector.load %arg3[%c0_1, %c0_2] : memref<128x128xbf16, #tpu.memory_space<vmem>>, vector<128x128xbf16>
    %cst = arith.constant dense<0.000000e+00> : vector<128x128xf32>
    %2 = tpu.matmul %0, %1, %cst {dimension_numbers = #tpu.dot_dimension_numbers<[1], [0], [0], [1], [0, 0, 1, 1], [], []>} : vector<128x128xbf16>, vector<128x128xbf16>, vector<128x128xf32> -> vector<128x128xf32>
    %c0_3 = arith.constant 0 : index
    %c0_4 = arith.constant 0 : index
    %3 = vector.load %arg4[%c0_3, %c0_4] : memref<1x128xf32, #tpu.memory_space<vmem>>, vector<1x128xf32>
    %4 = vector.broadcast %3 : vector<1x128xf32> to vector<128x128xf32>
    %5 = arith.addf %2, %4 : vector<128x128xf32>
    %cst_5 = arith.constant 0.000000e+00 : f32
    %6 = vector.broadcast %cst_5 : f32 to vector<128x128xf32>
    %7 = arith.cmpf ogt, %5, %6 : vector<128x128xf32>
    %cst_6 = arith.constant 1.000000e-01 : f32
    %8 = vector.broadcast %cst_6 : f32 to vector<128x128xf32>
    %9 = arith.mulf %8, %5 : vector<128x128xf32>
    %10 = arith.select %7, %5, %9 : vector<128x128xi1>, vector<128x128xf32>
    %11 = arith.truncf %10 : vector<128x128xf32> to vector<128x128xbf16>
    %c0_7 = arith.constant 0 : index
    %c0_8 = arith.constant 0 : index
    %12 = vector.load %arg5[%c0_7, %c0_8] : memref<128x128xbf16, #tpu.memory_space<vmem>>, vector<128x128xbf16>
    tpu.vector_store %arg5[%c0_7, %c0_8], %11 {strides = array<i32>} : memref<128x128xbf16, #tpu.memory_space<vmem>>, vector<128x128xbf16>,
    return
  }
  func.func @transform_0(%arg0: i32, %arg1: i32) -> (i32, i32) {
    %c0_i32 = arith.constant 0 : i32
    %c0_i32_0 = arith.constant 0 : i32
    return %arg0, %c0_i32 : i32, i32
  }
  func.func @transform_1(%arg0: i32, %arg1: i32) -> (i32, i32) {
    %c0_i32 = arith.constant 0 : i32
    %c0_i32_0 = arith.constant 0 : i32
    return %c0_i32, %arg1 : i32, i32
  }
  func.func @transform_2(%arg0: i32, %arg1: i32) -> (i32, i32) {
    %c0_i32 = arith.constant 0 : i32
    %c0_i32_0 = arith.constant 0 : i32
    return %c0_i32, %arg1 : i32, i32
  }
  func.func @transform_3(%arg0: i32, %arg1: i32) -> (i32, i32) {
    %c0_i32 = arith.constant 0 : i32
    return %arg0, %arg1 : i32, i32
  }
}

</mosaic_0001>

<bundles_post_ra>
// kernel: tpu_custom_call.1
= control target key start
LH: loop header
LB: loop body
LE: loop exit
PB: predicated region body
PF: predicated region fallthrough
CT: control target
= control target key end

     0   :  { %8 = vsyncpa [#allocation3], 0  ;;  %s770_s0 = inlined_call_operand.hbm [shape: bf16[128,128], index: 0, kind: input, shape index: {}]   ;;  %s771_s1 = inlined_call_operand.hbm [shape: bf16[128,128], index: 1, kind: input, shape index: {}]   ;;  %s772_s2 = inlined_call_operand.vmem [shape: f32[1,128], index: 2, kind: input, shape index: {}]   ;;  %s773_s3 = inlined_call_operand.hbm [shape: bf16[128,128], index: 3, kind: output, shape index: {}]  }
   0x1   :  { %9 = vsyncpa [#allocation6], 0 }
   0x2   :  { %10 = vsyncpa [#allocation4], 0  ;;  %s675_s12 = smov [#allocation2]   ;;  %s603_s16 = scalar_lea.hbm %s770_s0, 1024 }
   0x3   :  { %s16_s13 = sshll.u32 %s675_s12, 4  ;;  %p604_p0 = scmp.ne.s32.totalorder %s770_s0, %s603_s16  ;;  %s17_s13 = int_to_ptr.vmem [resolvable:$true] %s16_s13 }
   0x4   :  { %p607_p1 = scmp.lt.u32.totalorder %s603_s16, %s770_s0 }
   0x6   :  { %p609_p2 = pnand %p607_p1, %p604_p0 }
   0x8   :  { %612 = shalt.err (!%p609_p2)
}
   0x9   :  { %s613_s21 = scalar_lea.vmem %s17_s13, 1024  ;;  %p618_p4 = scmp.lt.s32.totalorder %s17_s13, %s17_s13 }
   0xa   :  { %p614_p3 = scmp.ne.s32.totalorder %s17_s13, %s613_s21  ;;  %p619_p5 = scmp.lt.s32.totalorder %s613_s21, %s613_s21 }
   0xc   :  { %p620_p6 = por %p619_p5, %p618_p4 }
   0xe   :  { %p621_p7 = pnand %p620_p6, %p614_p3 }
  0x10   :  { %624 = shalt.err (!%p621_p7)
}
  0x11   :  { %s676_s22 = smov 64   ;;  %s677_s23 = smov 4  }
  0x12   :  { %22 = dma.hbm_to_vmem [thread:$0]  %s770_s0, 1024, %s17_s13, [#allocation3], %s676_s22, %s676_s22, %s677_s23  }
  0x13   :  { %s678_s26 = smov [#allocation5]   ;;  %s625_s30 = scalar_lea.hbm %s771_s1, 1024 }
  0x14   :  { %s28_s27 = sshll.u32 %s678_s26, 4  ;;  %p626_p8 = scmp.ne.s32.totalorder %s771_s1, %s625_s30  ;;  %s29_s27 = int_to_ptr.vmem [resolvable:$true] %s28_s27 }
  0x15   :  { %p629_p9 = scmp.lt.u32.totalorder %s625_s30, %s771_s1 }
  0x17   :  { %p631_p10 = pnand %p629_p9, %p626_p8 }
  0x19   :  { %634 = shalt.err (!%p631_p10)
}
  0x1a   :  { %s635_s8 = scalar_lea.vmem %s29_s27, 1024  ;;  %p640_p12 = scmp.lt.s32.totalorder %s29_s27, %s29_s27 }
  0x1b   :  { %p636_p11 = scmp.ne.s32.totalorder %s29_s27, %s635_s8  ;;  %p641_p13 = scmp.lt.s32.totalorder %s635_s8, %s635_s8 }
  0x1d   :  { %p642_p0 = por %p641_p13, %p640_p12 }
  0x1f   :  { %p643_p1 = pnand %p642_p0, %p636_p11 }
  0x21   :  { %646 = shalt.err (!%p643_p1)
}
  0x22   :  { %34 = dma.hbm_to_vmem [thread:$0]  %s771_s1, 1024, %s29_s27, [#allocation6], %s676_s22, %s676_s22, %s677_s23  }
  0x23   :  { %669 = dma.done.wait [#allocation3], 1024  }
  0x24   :  { %670 = vsyncadd [#allocation3], 4294966272 }
  0x25   :  { %671 = dma.done.wait [#allocation6], 1024  }
  0x26   :  { %672 = vsyncadd [#allocation6], 4294966272  ;;  %v587_v0 = vld [vmem:[#allocation5] sm:$0xff]   ;;  %v588_v1 = vld [vmem:[#allocation5 + $0x8] sm:$0xff]  }
  0x27   :  { %534 = vmatprep.subr.bf16.mxu0 %v587_v0  ;;  %566 = vmatprep.subr.bf16.mxu1 %v587_v0  ;;  %v589_v2 = vld [vmem:[#allocation5 + $0x10] sm:$0xff]   ;;  %v590_v3 = vld [vmem:[#allocation5 + $0x18] sm:$0xff]   ;;  %v595_v4 = vld [vmem:[#allocation2] sm:$0xff]  }
  0x28   :  { %535 = vmatpush3.bf16.msra.mxu0 %v587_v0  ;;  %574 = vmatpush3.bf16.msra.mxu1 %v587_v0  ;;  %v596_v5 = vld [vmem:[#allocation2 + $0x20] sm:$0xff]   ;;  %v592_v7 = vld [vmem:[#allocation5 + $0x28] sm:$0xff]   ;;  %v593_v8 = vld [vmem:[#allocation5 + $0x30] sm:$0xff]  }
  0x29   :  { %536 = vmatprep.subr.bf16.mxu0 %v588_v1  ;;  %567 = vmatprep.subr.bf16.mxu1 %v588_v1  ;;  %v591_v6 = vld [vmem:[#allocation5 + $0x20] sm:$0xff]   ;;  %v594_v9 = vld [vmem:[#allocation5 + $0x38] sm:$0xff]   ;;  %v597_v10 = vld [vmem:[#allocation2 + $0x8] sm:$0xff]  }
  0x2a   :  { %550 = vmatprep.mubr.bf16.mxu0 %v595_v4  ;;  %558 = vmatprep.mubr.bf16.mxu1 %v596_v5  ;;  %v598_v11 = vld [vmem:[#allocation2 + $0x28] sm:$0xff]   ;;  %v599_v12 = vld [vmem:[#allocation2 + $0x10] sm:$0xff]   ;;  %v601_v14 = vld [vmem:[#allocation2 + $0x18] sm:$0xff]  }
  0x2b   :  { %v600_v13 = vld [vmem:[#allocation2 + $0x30] sm:$0xff]   ;;  %v602_v15 = vld [vmem:[#allocation2 + $0x38] sm:$0xff]   ;;  %v733_v16 = vld [vmem:[%s772_s2] ss:$0 sm:$0xff]  ;;  %s679_s2 = smov [#allocation7]  }
  0x2c   :  { %537 = vmatpush3.bf16.msra.mxu0 %v588_v1  ;;  %575 = vmatpush3.bf16.msra.mxu1 %v588_v1  ;;  %s409_s11 = sshll.u32 %s679_s2, 4  ;;  %s410_s11 = int_to_ptr.vmem [resolvable:$true] %s409_s11 }
  0x2d   :  { %538 = vmatprep.subr.bf16.mxu0 %v589_v2  ;;  %568 = vmatprep.subr.bf16.mxu1 %v589_v2  ;;  %s647_s12 = scalar_lea.vmem %s410_s11, 1024  ;;  %p652_p3 = scmp.lt.s32.totalorder %s410_s11, %s410_s11 }
  0x2e   :  { %p648_p2 = scmp.ne.s32.totalorder %s410_s11, %s647_s12  ;;  %p653_p4 = scmp.lt.s32.totalorder %s647_s12, %s647_s12 }
  0x30   :  { %539 = vmatpush3.bf16.msra.mxu0 %v589_v2  ;;  %576 = vmatpush3.bf16.msra.mxu1 %v589_v2  ;;  %p654_p5 = por %p653_p4, %p652_p3 }
  0x31   :  { %540 = vmatprep.subr.bf16.mxu0 %v590_v3  ;;  %569 = vmatprep.subr.bf16.mxu1 %v590_v3 }
  0x32   :  { %p655_p6 = pnand %p654_p5, %p648_p2 }
  0x34   :  { %541 = vmatpush3.bf16.msra.mxu0 %v590_v3  ;;  %577 = vmatpush3.bf16.msra.mxu1 %v590_v3 }
  0x35   :  { %542 = vmatprep.subr.bf16.mxu0 %v591_v6  ;;  %570 = vmatprep.subr.bf16.mxu1 %v591_v6 }
  0x38   :  { %543 = vmatpush3.bf16.msra.mxu0 %v591_v6  ;;  %578 = vmatpush3.bf16.msra.mxu1 %v591_v6 }
  0x39   :  { %544 = vmatprep.subr.bf16.mxu0 %v592_v7  ;;  %571 = vmatprep.subr.bf16.mxu1 %v592_v7 }
  0x3c   :  { %545 = vmatpush3.bf16.msra.mxu0 %v592_v7  ;;  %579 = vmatpush3.bf16.msra.mxu1 %v592_v7 }
  0x3d   :  { %546 = vmatprep.subr.bf16.mxu0 %v593_v8  ;;  %572 = vmatprep.subr.bf16.mxu1 %v593_v8 }
  0x40   :  { %547 = vmatpush3.bf16.msra.mxu0 %v593_v8  ;;  %580 = vmatpush3.bf16.msra.mxu1 %v593_v8 }
  0x41   :  { %548 = vmatprep.subr.bf16.mxu0 %v594_v9  ;;  %573 = vmatprep.subr.bf16.mxu1 %v594_v9 }
  0x44   :  { %549 = vmatpush3.bf16.msra.mxu0 %v594_v9  ;;  %581 = vmatpush3.bf16.msra.mxu1 %v594_v9 }
  0x47   :  { %551 = vmatmul.mubr.bf16.vlgmr.msra.gmra.mrb[0].mxu0 %v597_v10  ;;  %559 = vmatmul.mubr.bf16.vlgmr.msra.gmra.mrb[0].mxu1 %v598_v11 }
  0x48   :  { %554 = vmatprep.mubr.bf16.mxu0 %v599_v12  ;;  %562 = vmatprep.mubr.bf16.mxu1 %v600_v13 }
  0x4f   :  { %555 = vmatmul.mubr.bf16.gmra.mrb[4].mxu0 %v601_v14  ;;  %563 = vmatmul.mubr.bf16.gmra.mrb[4].mxu1 %v602_v15 }
 0x11a   :  { %v552_v17 = vpop.f32.mrb[0].mxu0  ;;  %v560_v18 = vpop.f32.mrb[0].mxu1 }
 0x11b   :  { %v222_v19 = vadd.f32 %v552_v17, %v733_v16  ;;  %v254_v20 = vadd.f32 %v560_v18, %v733_v16  ;;  %v213_v21 = vpop.f32.mrb[1].mxu0  ;;  %v245_v22 = vpop.f32.mrb[1].mxu1 }
 0x11c   :  { %v214_v23 = vadd.f32 %v733_v16, %v213_v21  ;;  %v246_v24 = vadd.f32 %v733_v16, %v245_v22  ;;  %v553_v25 = vpop.f32.mrb[2].mxu0  ;;  %v561_v26 = vpop.f32.mrb[2].mxu1 }
 0x11d   :  { %vm278_vm0 = vcmp.gt.f32.partialorder %v222_v19, 0.0  ;;  %v294_v27 = vmul.f32 0.1, %v222_v19  ;;  %vm286_vm1 = vcmp.gt.f32.partialorder %v254_v20, 0.0  ;;  %v302_v28 = vmul.f32 0.1, %v254_v20 }
 0x11e   :  { %vm276_vm2 = vcmp.gt.f32.partialorder %v214_v23, 0.0  ;;  %v292_v29 = vmul.f32 0.1, %v214_v23  ;;  %vm284_vm3 = vcmp.gt.f32.partialorder %v246_v24, 0.0  ;;  %v300_v30 = vmul.f32 0.1, %v246_v24 }
 0x11f   :  { %v225_v31 = vadd.f32 %v553_v25, %v733_v16  ;;  %v257_v32 = vadd.f32 %v561_v26, %v733_v16  ;;  %v216_v33 = vpop.f32.mrb[3].mxu0  ;;  %v248_v34 = vpop.f32.mrb[3].mxu1  ;;  %v310_v35 = vsel %vm278_vm0, %v222_v19, %v294_v27  ;;  %v318_v36 = vsel %vm286_vm1, %v254_v20, %v302_v28 }
 0x120   :  { %v217_v37 = vadd.f32 %v733_v16, %v216_v33  ;;  %v249_v38 = vadd.f32 %v733_v16, %v248_v34  ;;  %v308_v43 = vsel %vm276_vm2, %v214_v23, %v292_v29  ;;  %v316_v44 = vsel %vm284_vm3, %v246_v24, %v300_v30 }
 0x121   :  { %vm279_vm4 = vcmp.gt.f32.partialorder %v225_v31, 0.0  ;;  %v295_v39 = vmul.f32 0.1, %v225_v31  ;;  %vm287_vm5 = vcmp.gt.f32.partialorder %v257_v32, 0.0  ;;  %v303_v40 = vmul.f32 0.1, %v257_v32 }
 0x122   :  { %vm277_vm6 = vcmp.gt.f32.partialorder %v217_v37, 0.0  ;;  %v293_v41 = vmul.f32 0.1, %v217_v37  ;;  %vm285_vm7 = vcmp.gt.f32.partialorder %v249_v38, 0.0  ;;  %v301_v42 = vmul.f32 0.1, %v249_v38 }
 0x123   :  { %v311_v45 = vsel %vm279_vm4, %v225_v31, %v295_v39  ;;  %v319_v46 = vsel %vm287_vm5, %v257_v32, %v303_v40  ;;  %v556_v47 = vpop.f32.mrb[4].mxu0  ;;  %v564_v48 = vpop.f32.mrb[4].mxu1 }
 0x124   :  { %v479_v49 = vpack.c.bf16 %v311_v45, %v310_v35  ;;  %v499_v50 = vpack.c.bf16 %v319_v46, %v318_v36  ;;  %v309_v51 = vsel %vm277_vm6, %v217_v37, %v293_v41  ;;  %v317_v52 = vsel %vm285_vm7, %v249_v38, %v301_v42  ;;  %v229_v53 = vpop.f32.mrb[5].mxu0  ;;  %v261_v54 = vpop.f32.mrb[5].mxu1 }
 0x125   :  { %v474_v55 = vpack.c.bf16 %v309_v51, %v308_v43  ;;  %v494_v56 = vpack.c.bf16 %v317_v52, %v316_v44  ;;  %v238_v57 = vadd.f32 %v556_v47, %v733_v16  ;;  %v270_v58 = vadd.f32 %v564_v48, %v733_v16  ;;  %v557_v59 = vpop.f32.mrb[6].mxu0  ;;  %v565_v60 = vpop.f32.mrb[6].mxu1 }
 0x126   :  { %511 = vst [vmem:[#allocation7 + $0x8] sm:$0xff] %v479_v49   ;;  %515 = vst [vmem:[#allocation7 + $0x28] sm:$0xff] %v499_v50   ;;  %v230_v61 = vadd.f32 %v733_v16, %v229_v53  ;;  %v262_v62 = vadd.f32 %v733_v16, %v261_v54  ;;  %v241_v63 = vadd.f32 %v557_v59, %v733_v16  ;;  %v232_v1 = vpop.f32.mrb[7].mxu0  ;;  %v264_v2 = vpop.f32.mrb[7].mxu1 }
 0x127   :  { %v273_v0 = vadd.f32 %v565_v60, %v733_v16  ;;  %475 = vst [vmem:[#allocation7] sm:$0xff] %v474_v55   ;;  %514 = vst [vmem:[#allocation7 + $0x20] sm:$0xff] %v494_v56   ;;  %v298_v3 = vmul.f32 0.1, %v238_v57  ;;  %vm282_vm8 = vcmp.gt.f32.partialorder %v238_v57, 0.0  ;;  %vm290_vm9 = vcmp.gt.f32.partialorder %v270_v58, 0.0 }
 0x128   :  { %v306_v4 = vmul.f32 0.1, %v270_v58  ;;  %vm280_vm10 = vcmp.gt.f32.partialorder %v230_v61, 0.0  ;;  %vm283_vm11 = vcmp.gt.f32.partialorder %v241_v63, 0.0  ;;  %v299_v5 = vmul.f32 0.1, %v241_v63 }
 0x129   :  { %v296_v6 = vmul.f32 0.1, %v230_v61  ;;  %vm288_vm12 = vcmp.gt.f32.partialorder %v262_v62, 0.0  ;;  %vm291_vm13 = vcmp.gt.f32.partialorder %v273_v0, 0.0  ;;  %v307_v7 = vmul.f32 0.1, %v273_v0 }
 0x12a   :  { %v314_v8 = vsel %vm282_vm8, %v238_v57, %v298_v3  ;;  %v315_v9 = vsel %vm283_vm11, %v241_v63, %v299_v5  ;;  %v233_v10 = vadd.f32 %v733_v16, %v232_v1  ;;  %v265_v11 = vadd.f32 %v733_v16, %v264_v2 }
 0x12b   :  { %v322_v12 = vsel %vm290_vm9, %v270_v58, %v306_v4  ;;  %v304_v13 = vmul.f32 0.1, %v262_v62  ;;  %v489_v14 = vpack.c.bf16 %v315_v9, %v314_v8  ;;  %v323_v15 = vsel %vm291_vm13, %v273_v0, %v307_v7 }
 0x12c   :  { %v509_v17 = vpack.c.bf16 %v323_v15, %v322_v12  ;;  %vm281_vm14 = vcmp.gt.f32.partialorder %v233_v10, 0.0  ;;  %v297_v18 = vmul.f32 0.1, %v233_v10  ;;  %vm289_vm15 = vcmp.gt.f32.partialorder %v265_v11, 0.0 }
 0x12d   :  { %513 = vst [vmem:[#allocation7 + $0x18] sm:$0xff] %v489_v14   ;;  %v305_v19 = vmul.f32 0.1, %v265_v11  ;;  %v312_v20 = vsel %vm280_vm10, %v230_v61, %v296_v6  ;;  %v320_v22 = vsel %vm288_vm12, %v262_v62, %v304_v13 }
 0x12e   :  { %517 = vst [vmem:[#allocation7 + $0x38] sm:$0xff] %v509_v17   ;;  %v313_v21 = vsel %vm281_vm14, %v233_v10, %v297_v18 }
 0x12f   :  { %v484_v23 = vpack.c.bf16 %v313_v21, %v312_v20  ;;  %v321_v16 = vsel %vm289_vm15, %v265_v11, %v305_v19 }
 0x130   :  { %v504_v24 = vpack.c.bf16 %v321_v16, %v320_v22 }
 0x131   :  { %512 = vst [vmem:[#allocation7 + $0x10] sm:$0xff] %v484_v23  }
 0x132   :  { %516 = vst [vmem:[#allocation7 + $0x30] sm:$0xff] %v504_v24  }
 0x133   :  { %658 = shalt.err (!%p655_p6)
}
 0x134   :  { %s659_s15 = scalar_lea.hbm %s773_s3, 1024 }
 0x135   :  { %p660_p7 = scmp.ne.s32.totalorder %s773_s3, %s659_s15  ;;  %p663_p8 = scmp.lt.u32.totalorder %s659_s15, %s773_s3 }
 0x137   :  { %p665_p9 = pnand %p663_p8, %p660_p7 }
 0x139   :  { %668 = shalt.err (!%p665_p9)
}
 0x13a   :  { %415 = dma.vmem_to_hbm [thread:$0]  %s410_s11, 1024, %s773_s3, [#allocation4], %s676_s22, %s676_s22, %s677_s23  }
 0x13b   :  { %673 = dma.done.wait [#allocation4], 1024  }
 0x13c   :  { %674 = vsyncadd [#allocation4], 4294966272 }
 0x13d   :  { %419 = vsyncpa [#allocation3], 1 }
 0x13e   :  { %420 = vsyncpa [#allocation6], 1 }
 0x13f   :  { %421 = vsyncpa [#allocation4], 1 }

</bundles_post_ra>
